<compile_context>
chip_gen: v5e
topology: v5e:2x2
jax: 0.10.0
libtpu: 0.0.40
codegen_flags: <defaults>
</compile_context>

<pallas_src>
import functools

import jax
import jax.numpy as jnp
from jax.experimental import pallas as pl
from jax.experimental.pallas import tpu as pltpu

# args.* hyper-parameters, fixed deterministically in-script.
SIGMA_CE = 1.0
SIGMA_SP = 0.5
SIGMA_FEAT = 0.25

# Largest lane (batch) tile.  64 rows x 8192 lanes x 4 B x 2 buffers = 4 MiB
# of VMEM -- far below the default scoped-VMEM limit on all generations --
# while making per-step DMA bytes (~2 MiB) dwarf the fixed per-step overhead.
_DEFAULT_TB_MAX = 8192


def _round_up(x, m):
    return ((x + m - 1) // m) * m


def _patch_cycle_loss_kernel(
    slab_ref,    # (R, TB) packed features; batch on the 128-lane axis
    out_ref,     # (1, 1, 4) per-step partial [total, ce, sp, feat]
    *, sigma_ce, sigma_sp, sigma_feat, inv_b,
    num_classes, num_patches, num_coords, st_row0, batch, tb,
):
    C, P, D = num_classes, num_patches, num_coords
    step = pl.program_id(0)

    # Static sublane slices of the slab ref (sections are 8-row aligned).
    logits = slab_ref[0:C, :].astype(jnp.float32)                         # (C, TB)
    # Labels were stored as exact small integers in the slab's float dtype.
    labels = slab_ref[C:C + 1, :].astype(jnp.float32).astype(jnp.int32)   # (1, TB)
    st = slab_ref[st_row0:st_row0 + D * P, :].astype(jnp.float32)         # (D*P, TB)
    stb = slab_ref[st_row0 + D * P:st_row0 + 2 * D * P, :].astype(jnp.float32)
    r0 = st_row0 + 2 * D * P
    p12 = slab_ref[r0:r0 + P, :].astype(jnp.float32)                      # (P, TB)
    p21 = slab_ref[r0 + P:r0 + 2 * P, :].astype(jnp.float32)              # (P, TB)
    pos = slab_ref[r0 + 2 * P:r0 + 3 * P, :].astype(jnp.float32)          # (P, TB)

    # Lane validity mask: columns >= batch are wrapper padding and must not
    # contribute.  Padded columns can carry NaN through the zero-variance
    # feature branch, so mask with where (select), not multiply.
    lane = jax.lax.broadcasted_iota(jnp.int32, (1, tb), 1)
    valid = (step * tb + lane) < batch                                    # (1, TB)

    # ---------------- cross entropy: log-softmax over class sublanes --------
    cls_iota = jax.lax.broadcasted_iota(jnp.int32, (C, tb), 0)
    m = jnp.max(logits, axis=0, keepdims=True)
    lse = jnp.log(jnp.sum(jnp.exp(logits - m), axis=0, keepdims=True)) + m
    # NOTE: out-of-range labels silently select 0 here (valid inputs assumed).
    true_logit = jnp.sum(jnp.where(cls_iota == labels, logits, 0.0),
                         axis=0, keepdims=True)
    ce_col = lse - true_logit                                             # -log p[label]

    # Shared per-sample positive-count normalizer: approx EUP reciprocal plus
    # one Newton-Raphson step (~1e-7 relative error, off the VALU divide path).
    pos_num = jnp.sum(pos, axis=0, keepdims=True) + 0.0001                # (1, TB)
    inv_pos = pl.reciprocal(pos_num, approx=True)
    inv_pos = inv_pos * (2.0 - pos_num * inv_pos)

    # ---------------- spatial InfoNCE: -pos * log_softmax(sp_dist) ----------
    diff = st - stb
    sq = diff * diff                                                      # (D*P, TB)
    patch_sq = sq[0:P, :]
    for d in range(1, D):
        patch_sq = patch_sq + sq[d * P:(d + 1) * P, :]
    sp_dist = jnp.sqrt(patch_sq)                                          # (P, TB)
    sp_m = jnp.max(sp_dist, axis=0, keepdims=True)
    sp_lse = jnp.log(jnp.sum(jnp.exp(sp_dist - sp_m), axis=0, keepdims=True)) + sp_m
    sp_col = jnp.sum(pos * (sp_lse - sp_dist), axis=0, keepdims=True) * inv_pos

    # ---------------- feature InfoNCE ----------------------------------------
    prob0 = p12 * p21 * 10.0                                              # (P, TB)
    pm = jnp.max(prob0, axis=0, keepdims=True)
    pe = jnp.exp(prob0 - pm)
    # approx reciprocal is safe here ONLY because a uniform per-column scale
    # error on prob cancels exactly in z = (prob - mean(prob)) * rsqrt(var);
    # do not reuse `prob` anywhere the absolute scale matters.
    prob = pe * pl.reciprocal(jnp.sum(pe, axis=0, keepdims=True), approx=True)
    mean = jnp.sum(prob, axis=0, keepdims=True) * (1.0 / P)
    centered = prob - mean
    inv_std = jax.lax.rsqrt(jnp.sum(centered * centered, axis=0, keepdims=True)
                            * (1.0 / (P - 1)))
    z = centered * inv_std                                                # (P, TB)
    zm = jnp.max(z, axis=0, keepdims=True)
    z_lse = jnp.log(jnp.sum(jnp.exp(z - zm), axis=0, keepdims=True)) + zm
    feat_col = jnp.sum(pos * (z_lse - z), axis=0, keepdims=True) * inv_pos

    # ---------------- per-step partials: mask pads, reduce lanes, store ------
    ce = jnp.sum(jnp.where(valid, ce_col, 0.0), axis=1, keepdims=True) * (inv_b * sigma_ce)
    sp = jnp.sum(jnp.where(valid, sp_col, 0.0), axis=1, keepdims=True) * (inv_b * sigma_sp)
    ft = jnp.sum(jnp.where(valid, feat_col, 0.0), axis=1, keepdims=True) * (inv_b * sigma_feat)
    total = ce + sp + ft                                                  # (1, 1)
    sel = jax.lax.broadcasted_iota(jnp.int32, (1, 4), 1)
    out2d = (jnp.where(sel == 0, total, 0.0) + jnp.where(sel == 1, ce, 0.0)
             + jnp.where(sel == 2, sp, 0.0) + jnp.where(sel == 3, ft, 0.0))
    out_ref[...] = out2d.reshape(1, 1, 4)


def patch_cycle_loss(logits, labels, st_locs, st_locs_back, p_sim_12, p_sim_21,
                     pos_onehot, *, sigma_ce=SIGMA_CE, sigma_sp=SIGMA_SP,
                     sigma_feat=SIGMA_FEAT, tb_max=_DEFAULT_TB_MAX):
    """Returns (losses, ce_loss, infonce_sp_loss, info_nce_loss) as f32 scalars."""
    B, C = logits.shape
    _, P, D = st_locs.shape
    tb_max = max(128, _round_up(int(tb_max), 128))

    # Keep the slab bf16 only if every float operand already is bf16 (labels
    # must stay exactly representable); otherwise f32.  Compute is always f32.
    float_ins = (logits, st_locs, st_locs_back, p_sim_12, p_sim_21, pos_onehot)
    all_bf16 = all(x.dtype == jnp.bfloat16 for x in float_ins)
    slab_dtype = jnp.bfloat16 if (all_bf16 and C <= 256) else jnp.float32

    # Slab row layout (8-sublane aligned sections):
    #   [0, C)          logits (classes on sublanes)
    #   [C, C+1)        labels, float-encoded exact integers
    #   [st_row0, +DP)  st_locs,      row d*P + p = coord d of patch p
    #   [.., +DP)       st_locs_back
    #   [.., +P) x3     p_sim_12, p_sim_21, pos_onehot
    head = C + 1
    st_row0 = _round_up(head, 8)
    tail = st_row0 + 2 * D * P + 3 * P
    rows = _round_up(tail, 8)

    t = lambda x: jnp.transpose(x.astype(slab_dtype), (1, 0))
    pieces = [t(logits), labels.astype(slab_dtype).reshape(1, B)]
    if st_row0 > head:
        pieces.append(jnp.zeros((st_row0 - head, B), slab_dtype))
    pieces += [
        jnp.transpose(st_locs.astype(slab_dtype), (2, 1, 0)).reshape(D * P, B),
        jnp.transpose(st_locs_back.astype(slab_dtype), (2, 1, 0)).reshape(D * P, B),
        t(p_sim_12), t(p_sim_21), t(pos_onehot),
    ]
    if rows > tail:
        pieces.append(jnp.zeros((rows - tail, B), slab_dtype))
    # Single concatenate: XLA fuses the small transposes/reshapes into one
    # producer fusion for the slab instead of 7 standalone transpose ops.
    slab = jnp.concatenate(pieces, axis=0)                                 # (rows, B)

    # Batch padding / tiling along the 128-lane axis.
    bp = _round_up(B, 128)
    if bp <= tb_max:
        tb, nsteps = bp, 1
    else:
        tb = tb_max
        bp = _round_up(B, tb)
        nsteps = bp // tb
    if bp > B:
        slab = jnp.pad(slab, ((0, 0), (0, bp - B)))

    kernel = functools.partial(
        _patch_cycle_loss_kernel,
        sigma_ce=float(sigma_ce), sigma_sp=float(sigma_sp),
        sigma_feat=float(sigma_feat), inv_b=1.0 / B,
        num_classes=C, num_patches=P, num_coords=D,
        st_row0=st_row0, batch=B, tb=tb)

    partials = pl.pallas_call(
        kernel,
        out_shape=jax.ShapeDtypeStruct((nsteps, 1, 4), jnp.float32),
        grid_spec=pltpu.PrefetchScalarGridSpec(
            num_scalar_prefetch=0,
            grid=(nsteps,),
            in_specs=[pl.BlockSpec((rows, tb), lambda i: (0, i))],
            out_specs=pl.BlockSpec((1, 1, 4), lambda i: (i, 0, 0)),
        ),
        compiler_params=pltpu.CompilerParams(
            # Each grid step writes its own partial-output block, so the batch
            # axis is genuinely parallel (shards across both TCs on v7x).
            dimension_semantics=("parallel",)),
    )(slab)

    res = jnp.sum(partials, axis=(0, 1))                                   # (4,)
    return res[0], res[1], res[2], res[3]


def _reference(logits, labels, st_locs, st_locs_back, p12, p21, pos,
               sigma_ce=SIGMA_CE, sigma_sp=SIGMA_SP, sigma_feat=SIGMA_FEAT):
    """Pure-JAX reference mirroring the PyTorch forward."""
    p_num = pos.shape[1]
    pos_num = pos.sum(1)
    log_probs = jax.nn.log_softmax(logits, axis=1)
    ce = -jnp.mean(jnp.take_along_axis(log_probs, labels[:, None], axis=1)) * sigma_ce
    sp_dist = jnp.sqrt(((st_locs - st_locs_back) ** 2).sum(2))
    log_sm_sp = -pos * jnp.log(jax.nn.softmax(sp_dist, axis=1))
    sp = jnp.mean(log_sm_sp.sum(1) / (pos_num + 0.0001)) * sigma_sp
    prob = jax.nn.softmax(p12 * p21 * 10.0, axis=1)
    mean = prob.mean(1, keepdims=True)
    stdv = jnp.sqrt(((prob - mean) ** 2).sum(1) / (p_num - 1))[:, None]
    z = (prob - mean) / stdv
    log_sm = -pos * jnp.log(jax.nn.softmax(z, axis=1))
    feat = jnp.mean(log_sm.sum(1) / (pos_num + 0.0001)) * sigma_feat
    return ce + sp + feat, ce, sp, feat


def _make_inputs(key, B, C, P, D):
    k = jax.random.split(key, 7)
    logits = jax.random.normal(k[0], (B, C), jnp.float32)
    labels = jax.random.randint(k[1], (B,), 0, C)
    st_locs = jax.random.normal(k[2], (B, P, D), jnp.float32)
    st_locs_back = jax.random.normal(k[3], (B, P, D), jnp.float32)
    p_sim_12 = jax.random.uniform(k[4], (B, P), jnp.float32)
    p_sim_21 = jax.random.uniform(k[5], (B, P), jnp.float32)
    pos_onehot = (jax.random.uniform(k[6], (B, P)) > 0.5).astype(jnp.float32)
    pos_onehot = pos_onehot.at[:, 0].set(1.0)  # guarantee >=1 positive per row
    return logits, labels, st_locs, st_locs_back, p_sim_12, p_sim_21, pos_onehot


if __name__ == "__main__":
    key = jax.random.PRNGKey(0)
    C, P, D = 4, 8, 2   # classes, patches, spatial coord dim

    # Case 1: tiny batch (pads to one 128-lane tile, single step).
    # Case 2: B=384, default tile -> single step with tb=384.
    # Case 3: B=200 with tb_max=128 -> 2 grid steps + lane-padding mask, which
    #         exercises the multi-step parallel partial-output path.
    cases = (
        (key, 2, _DEFAULT_TB_MAX),
        (jax.random.fold_in(key, 1), 384, _DEFAULT_TB_MAX),
        (jax.random.fold_in(key, 2), 200, 128),
    )
    for case_key, B, tb_max in cases:
        inputs = _make_inputs(case_key, B, C, P, D)
        outs = patch_cycle_loss(*inputs, tb_max=tb_max)
        outs = jax.block_until_ready(outs)
        ref = _reference(*inputs)
        for got, want in zip(outs, ref):
            assert jnp.allclose(got, want, rtol=1e-3, atol=2e-4), (B, got, want)

    print("KERNEL_OK")
</pallas_src>

<mosaic_0001>
module attributes {stable_mosaic.version = 11 : i64} {
  func.func @_patch_cycle_loss_kernel(%arg0: i32, %arg1: memref<64x128xf32, #tpu.memory_space<vmem>>, %arg2: memref<1x1x4xf32, #tpu.memory_space<vmem>>) attributes {dimension_semantics = [#tpu.dimension_semantics<parallel>], iteration_bounds = array<i64: 1>, scalar_prefetch = 0 : i64, scratch_operands = 0 : i64, tpu.core_type = #tpu.core_type<tc>, window_params = [{transform_indices = @transform_0, window_bounds = array<i64: 64, 128>}, {transform_indices = @transform_1, window_bounds = array<i64: 1, 1, 4>}]} {
    %c0 = arith.constant 0 : index
    %c0_0 = arith.constant 0 : index
    %0 = vector.load %arg1[%c0, %c0_0] : memref<64x128xf32, #tpu.memory_space<vmem>>, vector<4x128xf32>
    %c4 = arith.constant 4 : index
    %c0_1 = arith.constant 0 : index
    %1 = vector.load %arg1[%c4, %c0_1] : memref<64x128xf32, #tpu.memory_space<vmem>>, vector<1x128xf32>
    %2 = arith.fptosi %1 : vector<1x128xf32> to vector<1x128xi32>
    %c8 = arith.constant 8 : index
    %c0_2 = arith.constant 0 : index
    %3 = vector.load %arg1[%c8, %c0_2] : memref<64x128xf32, #tpu.memory_space<vmem>>, vector<16x128xf32>
    %c24 = arith.constant 24 : index
    %c0_3 = arith.constant 0 : index
    %4 = vector.load %arg1[%c24, %c0_3] : memref<64x128xf32, #tpu.memory_space<vmem>>, vector<16x128xf32>
    %c40 = arith.constant 40 : index
    %c0_4 = arith.constant 0 : index
    %5 = vector.load %arg1[%c40, %c0_4] : memref<64x128xf32, #tpu.memory_space<vmem>>, vector<8x128xf32>
    %c48 = arith.constant 48 : index
    %c0_5 = arith.constant 0 : index
    %6 = vector.load %arg1[%c48, %c0_5] : memref<64x128xf32, #tpu.memory_space<vmem>>, vector<8x128xf32>
    %c56 = arith.constant 56 : index
    %c0_6 = arith.constant 0 : index
    %7 = vector.load %arg1[%c56, %c0_6] : memref<64x128xf32, #tpu.memory_space<vmem>>, vector<8x128xf32>
    %8 = tpu.iota {dimensions = array<i32: 1>} : vector<1x128xi32>
    %c128_i32 = arith.constant 128 : i32
    %9 = arith.muli %arg0, %c128_i32 : i32
    %10 = vector.broadcast %9 : i32 to vector<1x128xi32>
    %11 = arith.addi %10, %8 : vector<1x128xi32>
    %c2_i32 = arith.constant 2 : i32
    %12 = vector.broadcast %c2_i32 : i32 to vector<1x128xi32>
    %13 = arith.cmpi slt, %11, %12 : vector<1x128xi32>
    %14 = tpu.iota {dimensions = array<i32: 0>} : vector<4x128xi32>
    %cst = arith.constant dense<0xFF800000> : vector<128xf32>
    %15 = vector.multi_reduction <maximumf>, %0, %cst [0] : vector<4x128xf32> to vector<128xf32>
    %16 = vector.shape_cast %15 : vector<128xf32> to vector<1x128xf32>
    %17 = vector.broadcast %16 : vector<1x128xf32> to vector<4x128xf32>
    %18 = arith.subf %0, %17 : vector<4x128xf32>
    %19 = math.exp %18 : vector<4x128xf32>
    %cst_7 = arith.constant dense<0.000000e+00> : vector<128xf32>
    %20 = vector.multi_reduction <add>, %19, %cst_7 [0] : vector<4x128xf32> to vector<128xf32>
    %21 = vector.shape_cast %20 : vector<128xf32> to vector<1x128xf32>
    %22 = math.log %21 : vector<1x128xf32>
    %23 = arith.addf %22, %16 : vector<1x128xf32>
    %24 = vector.broadcast %2 : vector<1x128xi32> to vector<4x128xi32>
    %25 = arith.cmpi eq, %14, %24 : vector<4x128xi32>
    %cst_8 = arith.constant 0.000000e+00 : f32
    %26 = vector.broadcast %cst_8 : f32 to vector<4x128xf32>
    %27 = arith.select %25, %0, %26 : vector<4x128xi1>, vector<4x128xf32>
    %cst_9 = arith.constant dense<0.000000e+00> : vector<128xf32>
    %28 = vector.multi_reduction <add>, %27, %cst_9 [0] : vector<4x128xf32> to vector<128xf32>
    %29 = vector.shape_cast %28 : vector<128xf32> to vector<1x128xf32>
    %30 = arith.subf %23, %29 : vector<1x128xf32>
    %cst_10 = arith.constant dense<0.000000e+00> : vector<128xf32>
    %31 = vector.multi_reduction <add>, %7, %cst_10 [0] : vector<8x128xf32> to vector<128xf32>
    %32 = vector.shape_cast %31 : vector<128xf32> to vector<1x128xf32>
    %cst_11 = arith.constant 9.99999974E-5 : f32
    %33 = vector.broadcast %cst_11 : f32 to vector<1x128xf32>
    %34 = arith.addf %32, %33 : vector<1x128xf32>
    %35 = tpu.reciprocal %34 {approx = true} : vector<1x128xf32> -> vector<1x128xf32>
    %36 = arith.mulf %34, %35 : vector<1x128xf32>
    %cst_12 = arith.constant 2.000000e+00 : f32
    %37 = vector.broadcast %cst_12 : f32 to vector<1x128xf32>
    %38 = arith.subf %37, %36 : vector<1x128xf32>
    %39 = arith.mulf %35, %38 : vector<1x128xf32>
    %40 = arith.subf %3, %4 : vector<16x128xf32>
    %41 = arith.mulf %40, %40 : vector<16x128xf32>
    %42 = vector.extract_strided_slice %41 {offsets = [0, 0], sizes = [8, 128], strides = [1, 1]} : vector<16x128xf32> to vector<8x128xf32>
    %43 = vector.extract_strided_slice %41 {offsets = [8, 0], sizes = [8, 128], strides = [1, 1]} : vector<16x128xf32> to vector<8x128xf32>
    %44 = arith.addf %42, %43 : vector<8x128xf32>
    %45 = math.sqrt %44 : vector<8x128xf32>
    %cst_13 = arith.constant dense<0xFF800000> : vector<128xf32>
    %46 = vector.multi_reduction <maximumf>, %45, %cst_13 [0] : vector<8x128xf32> to vector<128xf32>
    %47 = vector.shape_cast %46 : vector<128xf32> to vector<1x128xf32>
    %48 = vector.broadcast %47 : vector<1x128xf32> to vector<8x128xf32>
    %49 = arith.subf %45, %48 : vector<8x128xf32>
    %50 = math.exp %49 : vector<8x128xf32>
    %cst_14 = arith.constant dense<0.000000e+00> : vector<128xf32>
    %51 = vector.multi_reduction <add>, %50, %cst_14 [0] : vector<8x128xf32> to vector<128xf32>
    %52 = vector.shape_cast %51 : vector<128xf32> to vector<1x128xf32>
    %53 = math.log %52 : vector<1x128xf32>
    %54 = arith.addf %53, %47 : vector<1x128xf32>
    %55 = vector.broadcast %54 : vector<1x128xf32> to vector<8x128xf32>
    %56 = arith.subf %55, %45 : vector<8x128xf32>
    %57 = arith.mulf %7, %56 : vector<8x128xf32>
    %cst_15 = arith.constant dense<0.000000e+00> : vector<128xf32>
    %58 = vector.multi_reduction <add>, %57, %cst_15 [0] : vector<8x128xf32> to vector<128xf32>
    %59 = vector.shape_cast %58 : vector<128xf32> to vector<1x128xf32>
    %60 = arith.mulf %59, %39 : vector<1x128xf32>
    %61 = arith.mulf %5, %6 : vector<8x128xf32>
    %cst_16 = arith.constant 1.000000e+01 : f32
    %62 = vector.broadcast %cst_16 : f32 to vector<8x128xf32>
    %63 = arith.mulf %61, %62 : vector<8x128xf32>
    %cst_17 = arith.constant dense<0xFF800000> : vector<128xf32>
    %64 = vector.multi_reduction <maximumf>, %63, %cst_17 [0] : vector<8x128xf32> to vector<128xf32>
    %65 = vector.shape_cast %64 : vector<128xf32> to vector<1x128xf32>
    %66 = vector.broadcast %65 : vector<1x128xf32> to vector<8x128xf32>
    %67 = arith.subf %63, %66 : vector<8x128xf32>
    %68 = math.exp %67 : vector<8x128xf32>
    %cst_18 = arith.constant dense<0.000000e+00> : vector<128xf32>
    %69 = vector.multi_reduction <add>, %68, %cst_18 [0] : vector<8x128xf32> to vector<128xf32>
    %70 = vector.shape_cast %69 : vector<128xf32> to vector<1x128xf32>
    %71 = tpu.reciprocal %70 {approx = true} : vector<1x128xf32> -> vector<1x128xf32>
    %72 = vector.broadcast %71 : vector<1x128xf32> to vector<8x128xf32>
    %73 = arith.mulf %68, %72 : vector<8x128xf32>
    %cst_19 = arith.constant dense<0.000000e+00> : vector<128xf32>
    %74 = vector.multi_reduction <add>, %73, %cst_19 [0] : vector<8x128xf32> to vector<128xf32>
    %75 = vector.shape_cast %74 : vector<128xf32> to vector<1x128xf32>
    %cst_20 = arith.constant 1.250000e-01 : f32
    %76 = vector.broadcast %cst_20 : f32 to vector<1x128xf32>
    %77 = arith.mulf %75, %76 : vector<1x128xf32>
    %78 = vector.broadcast %77 : vector<1x128xf32> to vector<8x128xf32>
    %79 = arith.subf %73, %78 : vector<8x128xf32>
    %80 = arith.mulf %79, %79 : vector<8x128xf32>
    %cst_21 = arith.constant dense<0.000000e+00> : vector<128xf32>
    %81 = vector.multi_reduction <add>, %80, %cst_21 [0] : vector<8x128xf32> to vector<128xf32>
    %82 = vector.shape_cast %81 : vector<128xf32> to vector<1x128xf32>
    %cst_22 = arith.constant 0.142857149 : f32
    %83 = vector.broadcast %cst_22 : f32 to vector<1x128xf32>
    %84 = arith.mulf %82, %83 : vector<1x128xf32>
    %85 = math.rsqrt %84 : vector<1x128xf32>
    %86 = vector.broadcast %85 : vector<1x128xf32> to vector<8x128xf32>
    %87 = arith.mulf %79, %86 : vector<8x128xf32>
    %cst_23 = arith.constant dense<0xFF800000> : vector<128xf32>
    %88 = vector.multi_reduction <maximumf>, %87, %cst_23 [0] : vector<8x128xf32> to vector<128xf32>
    %89 = vector.shape_cast %88 : vector<128xf32> to vector<1x128xf32>
    %90 = vector.broadcast %89 : vector<1x128xf32> to vector<8x128xf32>
    %91 = arith.subf %87, %90 : vector<8x128xf32>
    %92 = math.exp %91 : vector<8x128xf32>
    %cst_24 = arith.constant dense<0.000000e+00> : vector<128xf32>
    %93 = vector.multi_reduction <add>, %92, %cst_24 [0] : vector<8x128xf32> to vector<128xf32>
    %94 = vector.shape_cast %93 : vector<128xf32> to vector<1x128xf32>
    %95 = math.log %94 : vector<1x128xf32>
    %96 = arith.addf %95, %89 : vector<1x128xf32>
    %97 = vector.broadcast %96 : vector<1x128xf32> to vector<8x128xf32>
    %98 = arith.subf %97, %87 : vector<8x128xf32>
    %99 = arith.mulf %7, %98 : vector<8x128xf32>
    %cst_25 = arith.constant dense<0.000000e+00> : vector<128xf32>
    %100 = vector.multi_reduction <add>, %99, %cst_25 [0] : vector<8x128xf32> to vector<128xf32>
    %101 = vector.shape_cast %100 : vector<128xf32> to vector<1x128xf32>
    %102 = arith.mulf %101, %39 : vector<1x128xf32>
    %cst_26 = arith.constant 0.000000e+00 : f32
    %103 = vector.broadcast %cst_26 : f32 to vector<1x128xf32>
    %104 = arith.select %13, %30, %103 : vector<1x128xi1>, vector<1x128xf32>
    %cst_27 = arith.constant dense<0.000000e+00> : vector<1xf32>
    %105 = vector.multi_reduction <add>, %104, %cst_27 [1] : vector<1x128xf32> to vector<1xf32>
    %106 = vector.shape_cast %105 : vector<1xf32> to vector<1x1xf32>
    %cst_28 = arith.constant 5.000000e-01 : f32
    %107 = vector.broadcast %cst_28 : f32 to vector<1x1xf32>
    %108 = arith.mulf %106, %107 : vector<1x1xf32>
    %cst_29 = arith.constant 0.000000e+00 : f32
    %109 = vector.broadcast %cst_29 : f32 to vector<1x128xf32>
    %110 = arith.select %13, %60, %109 : vector<1x128xi1>, vector<1x128xf32>
    %cst_30 = arith.constant dense<0.000000e+00> : vector<1xf32>
    %111 = vector.multi_reduction <add>, %110, %cst_30 [1] : vector<1x128xf32> to vector<1xf32>
    %112 = vector.shape_cast %111 : vector<1xf32> to vector<1x1xf32>
    %cst_31 = arith.constant 2.500000e-01 : f32
    %113 = vector.broadcast %cst_31 : f32 to vector<1x1xf32>
    %114 = arith.mulf %112, %113 : vector<1x1xf32>
    %cst_32 = arith.constant 0.000000e+00 : f32
    %115 = vector.broadcast %cst_32 : f32 to vector<1x128xf32>
    %116 = arith.select %13, %102, %115 : vector<1x128xi1>, vector<1x128xf32>
    %cst_33 = arith.constant dense<0.000000e+00> : vector<1xf32>
    %117 = vector.multi_reduction <add>, %116, %cst_33 [1] : vector<1x128xf32> to vector<1xf32>
    %118 = vector.shape_cast %117 : vector<1xf32> to vector<1x1xf32>
    %cst_34 = arith.constant 1.250000e-01 : f32
    %119 = vector.broadcast %cst_34 : f32 to vector<1x1xf32>
    %120 = arith.mulf %118, %119 : vector<1x1xf32>
    %121 = arith.addf %108, %114 : vector<1x1xf32>
    %122 = arith.addf %121, %120 : vector<1x1xf32>
    %123 = tpu.iota {dimensions = array<i32: 1>} : vector<1x4xi32>
    %c0_i32 = arith.constant 0 : i32
    %124 = vector.broadcast %c0_i32 : i32 to vector<1x4xi32>
    %125 = arith.cmpi eq, %123, %124 : vector<1x4xi32>
    %cst_35 = arith.constant 0.000000e+00 : f32
    %126 = vector.shape_cast %122 : vector<1x1xf32> to vector<1x1xf32>
    %127 = vector.broadcast %126 : vector<1x1xf32> to vector<1x4xf32>
    %128 = vector.broadcast %cst_35 : f32 to vector<1x4xf32>
    %129 = arith.select %125, %127, %128 : vector<1x4xi1>, vector<1x4xf32>
    %c1_i32 = arith.constant 1 : i32
    %130 = vector.broadcast %c1_i32 : i32 to vector<1x4xi32>
    %131 = arith.cmpi eq, %123, %130 : vector<1x4xi32>
    %cst_36 = arith.constant 0.000000e+00 : f32
    %132 = vector.shape_cast %108 : vector<1x1xf32> to vector<1x1xf32>
    %133 = vector.broadcast %132 : vector<1x1xf32> to vector<1x4xf32>
    %134 = vector.broadcast %cst_36 : f32 to vector<1x4xf32>
    %135 = arith.select %131, %133, %134 : vector<1x4xi1>, vector<1x4xf32>
    %136 = arith.addf %129, %135 : vector<1x4xf32>
    %c2_i32_37 = arith.constant 2 : i32
    %137 = vector.broadcast %c2_i32_37 : i32 to vector<1x4xi32>
    %138 = arith.cmpi eq, %123, %137 : vector<1x4xi32>
    %cst_38 = arith.constant 0.000000e+00 : f32
    %139 = vector.shape_cast %114 : vector<1x1xf32> to vector<1x1xf32>
    %140 = vector.broadcast %139 : vector<1x1xf32> to vector<1x4xf32>
    %141 = vector.broadcast %cst_38 : f32 to vector<1x4xf32>
    %142 = arith.select %138, %140, %141 : vector<1x4xi1>, vector<1x4xf32>
    %143 = arith.addf %136, %142 : vector<1x4xf32>
    %c3_i32 = arith.constant 3 : i32
    %144 = vector.broadcast %c3_i32 : i32 to vector<1x4xi32>
    %145 = arith.cmpi eq, %123, %144 : vector<1x4xi32>
    %cst_39 = arith.constant 0.000000e+00 : f32
    %146 = vector.shape_cast %120 : vector<1x1xf32> to vector<1x1xf32>
    %147 = vector.broadcast %146 : vector<1x1xf32> to vector<1x4xf32>
    %148 = vector.broadcast %cst_39 : f32 to vector<1x4xf32>
    %149 = arith.select %145, %147, %148 : vector<1x4xi1>, vector<1x4xf32>
    %150 = arith.addf %143, %149 : vector<1x4xf32>
    %151 = vector.shape_cast %150 : vector<1x4xf32> to vector<1x1x4xf32>
    %c0_40 = arith.constant 0 : index
    %c0_41 = arith.constant 0 : index
    %c0_42 = arith.constant 0 : index
    %152 = vector.load %arg2[%c0_40, %c0_41, %c0_42] : memref<1x1x4xf32, #tpu.memory_space<vmem>>, vector<1x1x4xf32>
    tpu.vector_store %arg2[%c0_40, %c0_41, %c0_42], %151 {strides = array<i32>} : memref<1x1x4xf32, #tpu.memory_space<vmem>>, vector<1x1x4xf32>,
    return
  }
  func.func @transform_0(%arg0: i32) -> (i32, i32) {
    %c0_i32 = arith.constant 0 : i32
    %c0_i32_0 = arith.constant 0 : i32
    return %c0_i32, %arg0 : i32, i32
  }
  func.func @transform_1(%arg0: i32) -> (i32, i32, i32) {
    %c0_i32 = arith.constant 0 : i32
    %c0_i32_0 = arith.constant 0 : i32
    %c0_i32_1 = arith.constant 0 : i32
    return %arg0, %c0_i32, %c0_i32_0 : i32, i32, i32
  }
}

</mosaic_0001>

<bundles_post_ra>
// kernel: tpu_custom_call.1
= control target key start
LH: loop header
LB: loop body
LE: loop exit
PB: predicated region body
PF: predicated region fallthrough
CT: control target
= control target key end

     0   :  { %6 = vsyncpa [#allocation3], 0  ;;  %s372_s0 = inlined_call_operand.hbm [shape: f32[64,128], index: 0, kind: input, shape index: {}]   ;;  %s373_s1 = inlined_call_operand.hbm [shape: f32[1,1,4], index: 1, kind: output, shape index: {}]  }
   0x1   :  { %7 = vsyncpa [#allocation4], 0  ;;  %s12_s8 = sshll.u32 %s372_s0, 4  ;;  %s330_s9 = smov [#allocation2]   ;;  %s13_s8 = int_to_ptr.hbm [resolvable:$true] %s12_s8 }
   0x2   :  { %s14_s10 = sshll.u32 %s330_s9, 4  ;;  %s331_s11 = smov 128   ;;  %s15_s10 = int_to_ptr.vmem [resolvable:$true] %s14_s10 }
   0x3   :  { %s332_s12 = smov 8  }
   0x4   :  { %20 = dma.hbm_to_vmem [thread:$0]  %s13_s8, 1024, %s15_s10, [#allocation3], %s331_s11, %s331_s11, %s332_s12  }
   0x5   :  { %326 = dma.done.wait [#allocation3], 1024  }
   0x6   :  { %327 = vsyncadd [#allocation3], 4294966272  ;;  %vm43_vm0 = vcmask 1043456   ;;  %v25_v0 = vld [vmem:[#allocation2] sm:$0xf]  ;;  %v32_v1 = vld [vmem:[#allocation2 + $0x28] sm:$0xff]  ;;  %v35_v16 = vlaneseq }
   0x7   :  { %v26_v2 = vld [vmem:[#allocation2 + $0x4] sm:$0x1]  ;;  %v44_v3 = vsel %vm43_vm0, %v25_v0, -inf  ;;  %v33_v4 = vld [vmem:[#allocation2 + $0x30] sm:$0xff]  ;;  %v28_v30 = vld [vmem:[#allocation2 + $0x8] sm:$0xff]  ;;  %s333_s0 = smov [#allocation5]  }
   0x8   :  { %v45_v5 = vrot.slane %v44_v3, 4  ;;  %v130_v6 = vmul.f32 %v33_v4, %v32_v1  ;;  %v248_v7 = vceil.f32 %v26_v2  ;;  %v249_v8 = vfloor.f32 %v26_v2  ;;  %v29_v31 = vld [vmem:[#allocation2 + $0x10] sm:$0xff]  ;;  %v30_v32 = vld [vmem:[#allocation2 + $0x18] sm:$0xff]  ;;  %v31_v34 = vld [vmem:[#allocation2 + $0x20] sm:$0xff]  ;;  %s235_s13 = sshll.u32 %s333_s0, 4  ;;  %s237_s16 = sshll.u32 %s373_s1, 4  ;;  %s236_s13 = int_to_ptr.vmem [resolvable:$true] %s235_s13  ;;  %s238_s16 = int_to_ptr.hbm [resolvable:$true] %s237_s16 }
   0x9   :  { %vm247_vm1 = vcmp.lt.s32.totalorder %v26_v2, 0  ;;  %v42_v22 = vshrl.u32 %v35_v16, 7  ;;  %v86_v35 = vsub.f32 %v28_v30, %v30_v32  ;;  %v87_v37 = vsub.f32 %v29_v31, %v31_v34 }
   0xa   :  { %v46_v9 = vmax.f32 %v44_v3, %v45_v5  ;;  %v131_v10 = vmul.f32 10.0, %v130_v6  ;;  %v250_v13 = vsel %vm247_vm1, %v248_v7, %v249_v8  ;;  %v350_v4 = vand.u32 127, %v35_v16 }
   0xb   :  { %v251_v19 = vcvt.f32.s32 %v250_v13  ;;  %v88_v38 = vmul.f32 %v86_v35, %v86_v35  ;;  %v89_v40 = vmul.f32 %v87_v37, %v87_v37  ;;  %vm228_vm13 = vcmask 24576  }
   0xc   :  { %v47_v11 = vrot.slane %v46_v9, 2  ;;  %v132_v12 = vrot.slane %v131_v10, 4  ;;  %vm40_vm5 = vcmp.lt.s32.totalorder %v350_v4, 2  ;;  %vm219_vm9 = vcmp.eq.s32.totalorder %v350_v4, 1 }
   0xd   :  { %v64_v25 = vperm.slane %v251_v19, 0  ;;  %v90_v44 = vadd.f32 %v89_v40, %v88_v38  ;;  %vm217_vm10 = vcmp.eq.s32.totalorder %v350_v4, 0  ;;  %vm222_vm11 = vcmp.eq.s32.totalorder %v350_v4, 2 }
   0xe   :  { %v48_v14 = vmax.f32 %v46_v9, %v47_v11  ;;  %v133_v15 = vmax.f32 %v131_v10, %v132_v12  ;;  %vm225_vm12 = vcmp.eq.s32.totalorder %v350_v4, 3 }
   0xf   :  { %vm65_vm2 = vcmp.eq.s32.totalorder %v42_v22, %v64_v25  ;;  %vm98_vm3 = vcmp.eq.f32.partialorder %v90_v44, inf  ;;  %v101_v5 = vand.u32 2147483648, %v90_v44  ;;  %vm100_vm4 = vcmp.eq.f32.partialorder %v90_v44, 0.0 }
  0x10   :  { %v49_v17 = vrot.slane %v48_v14, 1  ;;  %v134_v18 = vrot.slane %v133_v15, 2  ;;  %v66_v29 = vsel %vm65_vm2, %v25_v0, 0.0 }
  0x11   :  { %v67_v36 = vsel %vm43_vm0, %v66_v29, 0.0 }
  0x12   :  { %v50_v20 = vmax.f32 %v48_v14, %v49_v17  ;;  %v135_v21 = vmax.f32 %v133_v15, %v134_v18  ;;  %v68_v42 = vrot.slane %v67_v36, 4 }
  0x14   :  { %v51_v23 = vsub.f32 %v25_v0, %v50_v20  ;;  %v136_v24 = vrot.slane %v135_v21, 1  ;;  %v69_v47 = vadd.f32 %v68_v42, %v67_v36 }
  0x16   :  { %v52_v26 = vmul.f32 1.442695, %v51_v23  ;;  %v137_v27 = vmax.f32 %v135_v21, %v136_v24  ;;  %v70_v52 = vrot.slane %v69_v47, 2 }
  0x18   :  { %256 = vpow2.f32 %v52_v26  ;;  %v138_v28 = vsub.f32 %v131_v10, %v137_v27  ;;  %v71_v59 = vadd.f32 %v70_v52, %v69_v47  ;;  %v355_v26 = vld [vmem:[#allocation2 + $0x38] sm:$0xff] }
  0x19   :  { %v75_v30 = vrot.slane %v355_v26, 4 }
  0x1a   :  { %v139_v33 = vmul.f32 1.442695, %v138_v28  ;;  %v72_v0 = vrot.slane %v71_v59, 1 }
  0x1b   :  { %v76_v34 = vadd.f32 %v75_v30, %v355_v26 }
  0x1c   :  { %258 = vpow2.f32 %v139_v33  ;;  %v73_v7 = vadd.f32 %v72_v0, %v71_v59 }
  0x1d   :  { %260 = vrsqrt.f32 %v90_v44  ;;  %v77_v37 = vrot.slane %v76_v34, 2 }
  0x1e   :  { %v257_v39 = vpop.eup %256 }
  0x1f   :  { %v54_v41 = vsel %vm43_vm0, %v257_v39, 0.0  ;;  %v78_v42 = vadd.f32 %v77_v37, %v76_v34 }
  0x20   :  { %v55_v43 = vrot.slane %v54_v41, 4 }
  0x21   :  { %v79_v47 = vrot.slane %v78_v42, 1 }
  0x22   :  { %v259_v45 = vpop.eup %258  ;;  %v56_v46 = vadd.f32 %v55_v43, %v54_v41 }
  0x23   :  { %v141_v48 = vrot.slane %v259_v45, 4  ;;  %v261_v54 = vpop.eup %260  ;;  %v80_v52 = vadd.f32 %v79_v47, %v78_v42 }
  0x24   :  { %v57_v49 = vrot.slane %v56_v46, 2  ;;  %v92_v56 = vmul.f32 %v261_v54, %v90_v44 }
  0x25   :  { %v142_v50 = vadd.f32 %v259_v45, %v141_v48 }
  0x26   :  { %v58_v51 = vadd.f32 %v57_v49, %v56_v46  ;;  %v93_v60 = vmul.f32 %v261_v54, %v92_v56 }
  0x27   :  { %v143_v53 = vrot.slane %v142_v50, 2 }
  0x28   :  { %v59_v55 = vrot.slane %v58_v51, 1  ;;  %v94_v62 = vmul.f32 0.5, %v93_v60 }
  0x29   :  { %v144_v57 = vadd.f32 %v143_v53, %v142_v50 }
  0x2a   :  { %v60_v58 = vadd.f32 %v59_v55, %v58_v51  ;;  %v95_v1 = vsub.f32 1.5, %v94_v62 }
  0x2b   :  { %v145_v61 = vrot.slane %v144_v57, 1 }
  0x2c   :  { %262 = vlog2.f32 %v60_v58  ;;  %v96_v2 = vmul.f32 %v261_v54, %v95_v1  ;;  %v81_v54 = vadd.f32 0.0001, %v80_v52 }
  0x2d   :  { %v146_v63 = vadd.f32 %v145_v61, %v144_v57 }
  0x2e   :  { %v97_v8 = vmul.f32 %v96_v2, %v90_v44 }
  0x2f   :  { %264 = vrcp.f32 %v146_v63 }
  0x30   :  { %v99_v11 = vsel %vm98_vm3, %v90_v44, %v97_v8 }
  0x31   :  { %v102_v12 = vsel %vm100_vm4, %v101_v5, %v99_v11 }
  0x32   :  { %v263_v3 = vpop.eup %262  ;;  %v103_v15 = vrot.slane %v102_v12, 4 }
  0x33   :  { %v62_v6 = vmul.f32 0.6931472, %v263_v3 }
  0x34   :  { %v104_v18 = vmax.f32 %v102_v12, %v103_v15 }
  0x35   :  { %v265_v9 = vpop.eup %264  ;;  %v63_v10 = vadd.f32 %v62_v6, %v50_v20 }
  0x36   :  { %v148_v13 = vmul.f32 %v265_v9, %v259_v45  ;;  %v105_v21 = vrot.slane %v104_v18, 2 }
  0x37   :  { %v74_v14 = vsub.f32 %v63_v10, %v73_v7 }
  0x38   :  { %v149_v17 = vrot.slane %v148_v13, 4  ;;  %v106_v23 = vmax.f32 %v104_v18, %v105_v21 }
  0x39   :  { %v203_v16 = vsel %vm40_vm5, %v74_v14, 0.0 }
  0x3a   :  { %204 = vadd.xlane.f32.xlu0 %v203_v16  ;;  %v150_v19 = vadd.f32 %v149_v17, %v148_v13  ;;  %v107_v25 = vrot.slane %v106_v23, 1 }
  0x3c   :  { %v151_v22 = vrot.slane %v150_v19, 2  ;;  %v108_v27 = vmax.f32 %v106_v23, %v107_v25 }
  0x3e   :  { %v152_v24 = vadd.f32 %v151_v22, %v150_v19  ;;  %v109_v29 = vsub.f32 %v102_v12, %v108_v27 }
  0x40   :  { %v153_v20 = vrot.slane %v152_v24, 1  ;;  %v110_v32 = vmul.f32 1.442695, %v109_v29 }
  0x42   :  { %v154_v28 = vadd.f32 %v153_v20, %v152_v24  ;;  %266 = vpow2.f32 %v110_v32 }
  0x44   :  { %v155_v31 = vmul.f32 0.125, %v154_v28 }
  0x46   :  { %v156_v33 = vsub.f32 %v148_v13, %v155_v31 }
  0x48   :  { %v157_v35 = vmul.f32 %v156_v33, %v156_v33  ;;  %v267_v39 = vpop.eup %266 }
  0x49   :  { %v112_v40 = vrot.slane %v267_v39, 4 }
  0x4a   :  { %v158_v36 = vrot.slane %v157_v35, 4 }
  0x4b   :  { %v113_v43 = vadd.f32 %v267_v39, %v112_v40 }
  0x4c   :  { %v159_v38 = vadd.f32 %v158_v36, %v157_v35 }
  0x4d   :  { %v114_v45 = vrot.slane %v113_v43, 2 }
  0x4e   :  { %v160_v41 = vrot.slane %v159_v38, 2 }
  0x4f   :  { %v115_v48 = vadd.f32 %v114_v45, %v113_v43 }
  0x50   :  { %v161_v44 = vadd.f32 %v160_v41, %v159_v38 }
  0x51   :  { %v116_v50 = vrot.slane %v115_v48, 1 }
  0x52   :  { %v162_v46 = vrot.slane %v161_v44, 1 }
  0x53   :  { %v117_v53 = vadd.f32 %v116_v50, %v115_v48 }
  0x54   :  { %v163_v49 = vadd.f32 %v162_v46, %v161_v44 }
  0x56   :  { %v164_v51 = vmul.f32 0.14285715, %v163_v49 }
  0x58   :  { %268 = vrsqrt.f32 %v164_v51  ;;  %vm171_vm6 = vweird.f32 %v164_v51 }
  0x59   :  { %270 = vlog2.f32 %v117_v53 }
  0x5a   :  { %272 = vrcp.f32 %v81_v54 }
  0x5e   :  { %v269_v55 = vpop.eup %268 }
  0x5f   :  { %v166_v56 = vmul.f32 %v269_v55, %v164_v51  ;;  %v271_v57 = vpop.eup %270  ;;  %vm172_vm7 = vweird.f32 %v269_v55 }
  0x60   :  { %v119_v58 = vmul.f32 0.6931472, %v271_v57  ;;  %v273_v0 = vpop.eup %272  ;;  %vm173_vm8 = vmor %vm171_vm6, %vm172_vm7 }
  0x61   :  { %v167_v59 = vmul.f32 %v269_v55, %v166_v56  ;;  %v83_v3 = vmul.f32 %v273_v0, %v81_v54 }
  0x62   :  { %v120_v60 = vadd.f32 %v119_v58, %v108_v27 }
  0x63   :  { %v168_v61 = vmul.f32 0.5, %v167_v59  ;;  %v84_v10 = vsub.f32 2.0, %v83_v3 }
  0x64   :  { %v121_v62 = vsub.f32 %v120_v60, %v102_v12 }
  0x65   :  { %v169_v63 = vsub.f32 1.5, %v168_v61  ;;  %v85_v17 = vmul.f32 %v273_v0, %v84_v10 }
  0x66   :  { %v122_v1 = vmul.f32 %v121_v62, %v355_v26 }
  0x67   :  { %v170_v2 = vmul.f32 %v269_v55, %v169_v63 }
  0x68   :  { %v123_v5 = vrot.slane %v122_v1, 4 }
  0x69   :  { %v174_v6 = vsel %vm173_vm8, %v269_v55, %v170_v2 }
  0x6a   :  { %v175_v7 = vmul.f32 %v174_v6, %v156_v33  ;;  %v124_v8 = vadd.f32 %v123_v5, %v122_v1 }
  0x6c   :  { %v176_v9 = vrot.slane %v175_v7, 4  ;;  %v125_v11 = vrot.slane %v124_v8, 2 }
  0x6e   :  { %v177_v13 = vmax.f32 %v175_v7, %v176_v9  ;;  %v126_v14 = vadd.f32 %v125_v11, %v124_v8 }
  0x70   :  { %v178_v15 = vrot.slane %v177_v13, 2  ;;  %v127_v16 = vrot.slane %v126_v14, 1 }
  0x72   :  { %v179_v12 = vmax.f32 %v177_v13, %v178_v15  ;;  %v128_v18 = vadd.f32 %v127_v16, %v126_v14 }
  0x74   :  { %v180_v19 = vrot.slane %v179_v12, 1  ;;  %v129_v21 = vmul.f32 %v128_v18, %v85_v17 }
  0x76   :  { %v181_v22 = vmax.f32 %v179_v12, %v180_v19  ;;  %v207_v23 = vsel %vm40_vm5, %v129_v21, 0.0 }
  0x77   :  { %208 = vadd.xlane.f32.xlu0 %v207_v23 }
  0x78   :  { %v182_v24 = vsub.f32 %v175_v7, %v181_v22 }
  0x7a   :  { %v183_v25 = vmul.f32 1.442695, %v182_v24 }
  0x7c   :  { %274 = vpow2.f32 %v183_v25 }
  0x82   :  { %v275_v20 = vpop.eup %274 }
  0x83   :  { %v185_v27 = vrot.slane %v275_v20, 4 }
  0x85   :  { %v186_v28 = vadd.f32 %v275_v20, %v185_v27 }
  0x87   :  { %v187_v29 = vrot.slane %v186_v28, 2 }
  0x89   :  { %v188_v30 = vadd.f32 %v187_v29, %v186_v28 }
  0x8b   :  { %v189_v31 = vrot.slane %v188_v30, 1 }
  0x8d   :  { %v190_v32 = vadd.f32 %v189_v31, %v188_v30 }
  0x8f   :  { %276 = vlog2.f32 %v190_v32 }
  0x95   :  { %v277_v33 = vpop.eup %276 }
  0x96   :  { %v192_v34 = vmul.f32 0.6931472, %v277_v33 }
  0x98   :  { %v193_v35 = vadd.f32 %v192_v34, %v181_v22 }
  0x9a   :  { %v194_v36 = vsub.f32 %v193_v35, %v175_v7 }
  0x9c   :  { %v195_v37 = vmul.f32 %v194_v36, %v355_v26 }
  0x9e   :  { %v196_v38 = vrot.slane %v195_v37, 4 }
  0xa0   :  { %v197_v39 = vadd.f32 %v196_v38, %v195_v37 }
  0xa2   :  { %v198_v40 = vrot.slane %v197_v39, 2 }
  0xa4   :  { %v199_v41 = vadd.f32 %v198_v40, %v197_v39 }
  0xa6   :  { %v200_v42 = vrot.slane %v199_v41, 1 }
  0xa8   :  { %v201_v43 = vadd.f32 %v200_v42, %v199_v41 }
  0xaa   :  { %v202_v44 = vmul.f32 %v201_v43, %v85_v17 }
  0xac   :  { %v211_v45 = vsel %vm40_vm5, %v202_v44, 0.0 }
  0xad   :  { %212 = vadd.xlane.f32.xlu1 %v211_v45  ;;  %v205_v46 = vpop.xlane.xlu0 %204 }
  0xae   :  { %v206_v48 = vmul.f32 0.5, %v205_v46 }
  0xb0   :  { %v220_v53 = vsel %vm219_vm9, %v206_v48, 0.0 }
  0xea   :  { %v209_v47 = vpop.xlane.xlu0 %208 }
  0xeb   :  { %v210_v49 = vmul.f32 0.25, %v209_v47 }
  0xed   :  { %v215_v51 = vadd.f32 %v210_v49, %v206_v48  ;;  %v223_v56 = vsel %vm222_vm11, %v210_v49, 0.0 }
 0x120   :  { %v213_v50 = vpop.xlane.xlu1 %212 }
 0x121   :  { %v214_v52 = vmul.f32 0.125, %v213_v50 }
 0x123   :  { %v216_v26 = vadd.f32 %v215_v51, %v214_v52  ;;  %v226_v58 = vsel %vm225_vm12, %v214_v52, 0.0 }
 0x125   :  { %v218_v54 = vsel %vm217_vm10, %v216_v26, 0.0 }
 0x126   :  { %v221_v55 = vadd.f32 %v220_v53, %v218_v54 }
 0x128   :  { %v224_v57 = vadd.f32 %v223_v56, %v221_v55 }
 0x12a   :  { %v227_v59 = vadd.f32 %v226_v58, %v224_v57 }
 0x12c   :  { %229 = vst.msk [vmem:[#allocation5] sm:$0x1] %vm228_vm13, %v227_v59 }
 0x12d   :  { %240 = dma.vmem_to_hbm [thread:$0]  %s236_s13, 16, %s238_s16, [#allocation4]  }
 0x12e   :  { %328 = dma.done.wait [#allocation4], 16  }
 0x12f   :  { %329 = vsyncadd [#allocation4], 4294967280 }
 0x130   :  { %245 = vsyncpa [#allocation3], 1 }
 0x131   :  { %246 = vsyncpa [#allocation4], 1 }

</bundles_post_ra>
